<compile_context>
chip_gen: v7x
topology: tpu7x:2x2x1
jax: 0.10.0
libtpu: 0.0.40
codegen_flags: <defaults>
</compile_context>

<pallas_src>
import jax
import jax.numpy as jnp
from jax.experimental import pallas as pl
from jax.experimental.pallas import tpu as pltpu


_UNROLL_THRESHOLD = 16   # static unroll below this, lax.fori_loop(unroll=8) above


def _vmem_capacity_bytes():
    """VMEM capacity of the current TPU generation (conservative fallback)."""
    try:
        info = pltpu.get_tpu_info()
        cap = getattr(info, "vmem_capacity_bytes", None)
        if cap:
            return int(cap)
    except Exception:
        pass
    return 64 * 1024 * 1024  # v7x-sized conservative default


def _choose_layers_per_step(num_layers, size):
    """Pick layers per grid step so each step streams a large weight block.

    Target: double-buffered bf16 weight block well inside VMEM, but at least
    ~1-2 MiB per step so the ~0.35 us per-grid-step overhead is amortized.
    The step count is balanced (cdiv both ways) so identity-padding is minimal.
    """
    vmem_cap = _vmem_capacity_bytes()
    # Per-block streamed-weight budget: ~1/5 of VMEM, clamped to [2 MiB, 24 MiB].
    budget = min(max(vmem_cap // 5, 2 << 20), 24 << 20)
    bytes_per_layer = size * (2 * size) * 2                      # bf16 fused weight
    cap = max(1, budget // max(bytes_per_layer, 1))
    num_steps = pl.cdiv(num_layers, min(cap, num_layers))
    layers_per_step = pl.cdiv(num_layers, num_steps)             # balanced, <= cap
    return layers_per_step, num_steps


def prepare_highway_params(wg, bg, wn, bn, layers_per_step):
    """One-time (init-time) parameter prep: fuse, cast to bf16, pad to a
    multiple of layers_per_step with exact-identity layers.

    wg, wn : (L, S, S) pre-transposed so layer l computes x @ wg[l] + bg[l]
    bg, bn : (L, S)
    Returns (w_fused, b_fused) with shapes (Lp, S, 2S) bf16 and (Lp, 1, 2S) f32.
    """
    L, S, _ = wg.shape
    w_fused = jnp.concatenate([wg, wn], axis=-1).astype(jnp.bfloat16)       # (L,S,2S)
    b_fused = jnp.concatenate([bg, bn], axis=-1).astype(jnp.float32)[:, None, :]

    num_steps = pl.cdiv(L, layers_per_step)
    padded_L = num_steps * layers_per_step
    pad = padded_L - L
    if pad:
        # Identity padding layer: W = 0, gate bias = -1e4 -> sigmoid == 0 in f32,
        # nonlinear = relu(0) = 0, so x + gate*(nonlinear - x) == x exactly.
        w_pad = jnp.zeros((pad, S, 2 * S), jnp.bfloat16)
        b_pad = jnp.concatenate(
            [jnp.full((pad, 1, S), -1e4, jnp.float32),
             jnp.zeros((pad, 1, S), jnp.float32)], axis=-1)
        w_fused = jnp.concatenate([w_fused, w_pad], axis=0)
        b_fused = jnp.concatenate([b_fused, b_pad], axis=0)
    return w_fused, b_fused


def _make_highway_kernel(layers_per_step):
    def layer_step(i, x, w_ref, b_ref, s):
        # One fused matmul: (B, S) @ (S, 2S) -> (B, 2S), f32 accumulation.
        z = jnp.dot(x.astype(jnp.bfloat16), w_ref[i],
                    preferred_element_type=jnp.float32) + b_ref[i]
        gate = jax.nn.sigmoid(z[:, :s])
        nonlinear = jnp.maximum(z[:, s:], 0.0)
        # g*n + (1-g)*x  ==  x + g*(n - x)
        return x + gate * (nonlinear - x)

    def kernel(x_ref, w_ref, b_ref, o_ref):
        # Seed the carried highway state with the input on the first grid step.
        @pl.when(pl.program_id(0) == 0)
        def _():
            o_ref[...] = x_ref[...]

        s = o_ref.shape[1]
        x = o_ref[...]                       # read resident state once per step
        if layers_per_step <= _UNROLL_THRESHOLD:
            for i in range(layers_per_step):                 # static unroll
                x = layer_step(i, x, w_ref, b_ref, s)
        else:
            # Sequential layer chain: full unroll buys no overlap, so keep code
            # size bounded with a partially unrolled fori_loop.
            x = jax.lax.fori_loop(
                0, layers_per_step,
                lambda i, xc: layer_step(i, xc, w_ref, b_ref, s),
                x, unroll=8)
        o_ref[...] = x                       # single store of the carried state

    return kernel


def highway_net_fused(x, w_fused, b_fused, layers_per_step):
    """Highway forward on pre-fused / pre-padded parameters.

    x       : (B, S) f32
    w_fused : (Lp, S, 2S) bf16, Lp a multiple of layers_per_step
    b_fused : (Lp, 1, 2S) f32
    NOTE: x's HBM buffer is donated to the output (input_output_aliases);
    callers must not reuse x after this call.
    """
    B, S = x.shape
    padded_L = w_fused.shape[0]
    assert padded_L % layers_per_step == 0
    num_steps = padded_L // layers_per_step

    # --- explicit VMEM budget (double-buffered streamed blocks + state) -----
    w_blk = layers_per_step * S * (2 * S) * 2             # bf16 weight block
    b_blk = layers_per_step * (2 * S) * 4                 # f32 bias block
    x_blk = B * S * 4
    vmem_need = 2 * (w_blk + b_blk) + 3 * x_blk + (4 << 20)   # + compiler headroom
    vmem_cap = _vmem_capacity_bytes()
    vmem_limit = int(min(max(vmem_need, 32 << 20), int(vmem_cap * 0.85)))

    # Advisory cost: bound by weight HBM traffic, not MXU.
    cost = pl.CostEstimate(
        flops=2 * padded_L * B * S * (2 * S) + 6 * padded_L * B * S,
        transcendentals=padded_L * B * S,                 # sigmoid
        bytes_accessed=int(w_fused.size * 2 + b_fused.size * 4 + 2 * x.size * 4),
    )

    kernel = _make_highway_kernel(layers_per_step)

    return pl.pallas_call(
        kernel,
        out_shape=jax.ShapeDtypeStruct((B, S), jnp.float32),
        grid_spec=pltpu.PrefetchScalarGridSpec(
            num_scalar_prefetch=0,
            grid=(num_steps,),
            in_specs=[
                pl.BlockSpec((B, S), lambda g: (0, 0)),                    # x (seed)
                pl.BlockSpec((layers_per_step, S, 2 * S),
                             lambda g: (g, 0, 0)),                         # fused W
                pl.BlockSpec((layers_per_step, 1, 2 * S),
                             lambda g: (g, 0, 0)),                         # fused b
            ],
            out_specs=pl.BlockSpec((B, S), lambda g: (0, 0)),              # resident state
        ),
        input_output_aliases={0: 0},   # x's HBM buffer backs the output
        compiler_params=pltpu.CompilerParams(
            dimension_semantics=("arbitrary",),           # layer axis carries state
            vmem_limit_bytes=vmem_limit,
        ),
        cost_estimate=cost,
    )(x, w_fused, b_fused)


def highway_net(x, wg, bg, wn, bn):
    """Convenience wrapper. In production, call prepare_highway_params() once
    at init and reuse (w_fused, b_fused) across calls; the fusion/cast/pad is
    NOT part of the per-call hot path."""
    B, S = x.shape
    L = wg.shape[0]
    layers_per_step, _ = _choose_layers_per_step(L, S)
    w_fused, b_fused = prepare_highway_params(wg, bg, wn, bn, layers_per_step)
    return highway_net_fused(x, w_fused, b_fused, layers_per_step)


def reference(x, wg, bg, wn, bn):
    # Pure-JAX f32 reference of the PyTorch forward (f = ReLU).
    # `linear = self.linear[layer](x)` is computed but unused in the PyTorch
    # forward, so it is omitted here as well.
    for l in range(wg.shape[0]):
        gate = jax.nn.sigmoid(x @ wg[l] + bg[l])
        nonlinear = jnp.maximum(x @ wn[l] + bn[l], 0.0)
        x = gate * nonlinear + (1.0 - gate) * x
    return x


if __name__ == "__main__":
    B, S, L = 8, 128, 3  # batch, hidden size, num_layers

    key = jax.random.PRNGKey(0)
    kx, kwg, kbg, kwn, kbn = jax.random.split(key, 5)
    bound = 1.0 / (S ** 0.5)  # mimic nn.Linear uniform init range
    x = jax.random.normal(kx, (B, S), dtype=jnp.float32)
    wg = jax.random.uniform(kwg, (L, S, S), jnp.float32, -bound, bound)
    bg = jax.random.uniform(kbg, (L, S), jnp.float32, -bound, bound)
    wn = jax.random.uniform(kwn, (L, S, S), jnp.float32, -bound, bound)
    bn = jax.random.uniform(kbn, (L, S), jnp.float32, -bound, bound)

    ref = jax.block_until_ready(reference(x, wg, bg, wn, bn))

    # One-time parameter prep (init-time), then the weight-streaming kernel.
    layers_per_step, _ = _choose_layers_per_step(L, S)
    w_fused, b_fused = prepare_highway_params(wg, bg, wn, bn, layers_per_step)
    w_fused, b_fused = jax.block_until_ready((w_fused, b_fused))

    out = jax.block_until_ready(highway_net_fused(x, w_fused, b_fused, layers_per_step))

    assert out.shape == (B, S)
    # Weights are streamed in bf16 -> slightly looser tolerance vs f32 reference.
    err = float(jnp.max(jnp.abs(out - ref)))
    assert err < 5e-2, f"mismatch vs reference: max abs err = {err}"
    print("KERNEL_OK")
</pallas_src>

<mosaic_0001>
module attributes {stable_mosaic.version = 11 : i64} {
  func.func @kernel(%arg0: i32, %arg1: memref<8x128xf32, #tpu.memory_space<vmem>>, %arg2: memref<3x128x256xbf16, #tpu.memory_space<vmem>>, %arg3: memref<3x1x256xf32, #tpu.memory_space<vmem>>, %arg4: memref<8x128xf32, #tpu.memory_space<vmem>>) attributes {dimension_semantics = [#tpu.dimension_semantics<arbitrary>], iteration_bounds = array<i64: 1>, scalar_prefetch = 0 : i64, scratch_operands = 0 : i64, tpu.core_type = #tpu.core_type<tc>, window_params = [{pipeline_mode = #tpu.pipeline_mode<synchronous>, transform_indices = @transform_0, window_bounds = array<i64: 8, 128>}, {transform_indices = @transform_1, window_bounds = array<i64: 3, 128, 256>}, {transform_indices = @transform_2, window_bounds = array<i64: 3, 1, 256>}, {pipeline_mode = #tpu.pipeline_mode<synchronous>, transform_indices = @transform_3, window_bounds = array<i64: 8, 128>}]} {
    %c0_i32 = arith.constant 0 : i32
    %0 = arith.cmpi eq, %arg0, %c0_i32 : i32
    %1 = arith.extui %0 : i1 to i32
    %c0_i32_0 = arith.constant 0 : i32
    %2 = arith.cmpi ne, %1, %c0_i32_0 : i32
    scf.if %2 {
      %c0_28 = arith.constant 0 : index
      %c0_29 = arith.constant 0 : index
      %65 = vector.load %arg1[%c0_28, %c0_29] : memref<8x128xf32, #tpu.memory_space<vmem>>, vector<8x128xf32>
      %c0_30 = arith.constant 0 : index
      %c0_31 = arith.constant 0 : index
      %66 = vector.load %arg4[%c0_30, %c0_31] : memref<8x128xf32, #tpu.memory_space<vmem>>, vector<8x128xf32>
      tpu.vector_store %arg4[%c0_30, %c0_31], %65 {strides = array<i32>} : memref<8x128xf32, #tpu.memory_space<vmem>>, vector<8x128xf32>,
    } else {
    }
    %c0 = arith.constant 0 : index
    %c0_1 = arith.constant 0 : index
    %3 = vector.load %arg4[%c0, %c0_1] : memref<8x128xf32, #tpu.memory_space<vmem>>, vector<8x128xf32>
    %4 = arith.truncf %3 : vector<8x128xf32> to vector<8x128xbf16>
    %c0_2 = arith.constant 0 : index
    %c0_3 = arith.constant 0 : index
    %c0_4 = arith.constant 0 : index
    %5 = vector.load %arg2[%c0_2, %c0_3, %c0_4] : memref<3x128x256xbf16, #tpu.memory_space<vmem>>, vector<1x128x256xbf16>
    %6 = vector.shape_cast %5 : vector<1x128x256xbf16> to vector<128x256xbf16>
    %cst = arith.constant dense<0.000000e+00> : vector<8x256xf32>
    %7 = tpu.matmul %4, %6, %cst {dimension_numbers = #tpu.dot_dimension_numbers<[1], [0], [0], [1], [0, 0, 1, 1], [], []>} : vector<8x128xbf16>, vector<128x256xbf16>, vector<8x256xf32> -> vector<8x256xf32>
    %c0_5 = arith.constant 0 : index
    %c0_6 = arith.constant 0 : index
    %c0_7 = arith.constant 0 : index
    %8 = vector.load %arg3[%c0_5, %c0_6, %c0_7] : memref<3x1x256xf32, #tpu.memory_space<vmem>>, vector<1x1x256xf32>
    %9 = vector.shape_cast %8 : vector<1x1x256xf32> to vector<1x256xf32>
    %10 = vector.broadcast %9 : vector<1x256xf32> to vector<8x256xf32>
    %11 = arith.addf %7, %10 : vector<8x256xf32>
    %12 = vector.extract_strided_slice %11 {offsets = [0, 0], sizes = [8, 128], strides = [1, 1]} : vector<8x256xf32> to vector<8x128xf32>
    %13 = arith.negf %12 : vector<8x128xf32>
    %14 = math.exp %13 : vector<8x128xf32>
    %cst_8 = arith.constant 1.000000e+00 : f32
    %15 = vector.broadcast %cst_8 : f32 to vector<8x128xf32>
    %16 = arith.addf %15, %14 : vector<8x128xf32>
    %17 = arith.divf %15, %16 : vector<8x128xf32>
    %18 = vector.extract_strided_slice %11 {offsets = [0, 128], sizes = [8, 128], strides = [1, 1]} : vector<8x256xf32> to vector<8x128xf32>
    %cst_9 = arith.constant 0.000000e+00 : f32
    %19 = vector.broadcast %cst_9 : f32 to vector<8x128xf32>
    %20 = arith.maximumf %18, %19 : vector<8x128xf32>
    %21 = arith.subf %20, %3 : vector<8x128xf32>
    %22 = arith.mulf %17, %21 : vector<8x128xf32>
    %23 = arith.addf %3, %22 : vector<8x128xf32>
    %24 = arith.truncf %23 : vector<8x128xf32> to vector<8x128xbf16>
    %c1 = arith.constant 1 : index
    %c0_10 = arith.constant 0 : index
    %c0_11 = arith.constant 0 : index
    %25 = vector.load %arg2[%c1, %c0_10, %c0_11] : memref<3x128x256xbf16, #tpu.memory_space<vmem>>, vector<1x128x256xbf16>
    %26 = vector.shape_cast %25 : vector<1x128x256xbf16> to vector<128x256xbf16>
    %cst_12 = arith.constant dense<0.000000e+00> : vector<8x256xf32>
    %27 = tpu.matmul %24, %26, %cst_12 {dimension_numbers = #tpu.dot_dimension_numbers<[1], [0], [0], [1], [0, 0, 1, 1], [], []>} : vector<8x128xbf16>, vector<128x256xbf16>, vector<8x256xf32> -> vector<8x256xf32>
    %c1_13 = arith.constant 1 : index
    %c0_14 = arith.constant 0 : index
    %c0_15 = arith.constant 0 : index
    %28 = vector.load %arg3[%c1_13, %c0_14, %c0_15] : memref<3x1x256xf32, #tpu.memory_space<vmem>>, vector<1x1x256xf32>
    %29 = vector.shape_cast %28 : vector<1x1x256xf32> to vector<1x256xf32>
    %30 = vector.broadcast %29 : vector<1x256xf32> to vector<8x256xf32>
    %31 = arith.addf %27, %30 : vector<8x256xf32>
    %32 = vector.extract_strided_slice %31 {offsets = [0, 0], sizes = [8, 128], strides = [1, 1]} : vector<8x256xf32> to vector<8x128xf32>
    %33 = arith.negf %32 : vector<8x128xf32>
    %34 = math.exp %33 : vector<8x128xf32>
    %cst_16 = arith.constant 1.000000e+00 : f32
    %35 = vector.broadcast %cst_16 : f32 to vector<8x128xf32>
    %36 = arith.addf %35, %34 : vector<8x128xf32>
    %37 = arith.divf %35, %36 : vector<8x128xf32>
    %38 = vector.extract_strided_slice %31 {offsets = [0, 128], sizes = [8, 128], strides = [1, 1]} : vector<8x256xf32> to vector<8x128xf32>
    %cst_17 = arith.constant 0.000000e+00 : f32
    %39 = vector.broadcast %cst_17 : f32 to vector<8x128xf32>
    %40 = arith.maximumf %38, %39 : vector<8x128xf32>
    %41 = arith.subf %40, %23 : vector<8x128xf32>
    %42 = arith.mulf %37, %41 : vector<8x128xf32>
    %43 = arith.addf %23, %42 : vector<8x128xf32>
    %44 = arith.truncf %43 : vector<8x128xf32> to vector<8x128xbf16>
    %c2 = arith.constant 2 : index
    %c0_18 = arith.constant 0 : index
    %c0_19 = arith.constant 0 : index
    %45 = vector.load %arg2[%c2, %c0_18, %c0_19] : memref<3x128x256xbf16, #tpu.memory_space<vmem>>, vector<1x128x256xbf16>
    %46 = vector.shape_cast %45 : vector<1x128x256xbf16> to vector<128x256xbf16>
    %cst_20 = arith.constant dense<0.000000e+00> : vector<8x256xf32>
    %47 = tpu.matmul %44, %46, %cst_20 {dimension_numbers = #tpu.dot_dimension_numbers<[1], [0], [0], [1], [0, 0, 1, 1], [], []>} : vector<8x128xbf16>, vector<128x256xbf16>, vector<8x256xf32> -> vector<8x256xf32>
    %c2_21 = arith.constant 2 : index
    %c0_22 = arith.constant 0 : index
    %c0_23 = arith.constant 0 : index
    %48 = vector.load %arg3[%c2_21, %c0_22, %c0_23] : memref<3x1x256xf32, #tpu.memory_space<vmem>>, vector<1x1x256xf32>
    %49 = vector.shape_cast %48 : vector<1x1x256xf32> to vector<1x256xf32>
    %50 = vector.broadcast %49 : vector<1x256xf32> to vector<8x256xf32>
    %51 = arith.addf %47, %50 : vector<8x256xf32>
    %52 = vector.extract_strided_slice %51 {offsets = [0, 0], sizes = [8, 128], strides = [1, 1]} : vector<8x256xf32> to vector<8x128xf32>
    %53 = arith.negf %52 : vector<8x128xf32>
    %54 = math.exp %53 : vector<8x128xf32>
    %cst_24 = arith.constant 1.000000e+00 : f32
    %55 = vector.broadcast %cst_24 : f32 to vector<8x128xf32>
    %56 = arith.addf %55, %54 : vector<8x128xf32>
    %57 = arith.divf %55, %56 : vector<8x128xf32>
    %58 = vector.extract_strided_slice %51 {offsets = [0, 128], sizes = [8, 128], strides = [1, 1]} : vector<8x256xf32> to vector<8x128xf32>
    %cst_25 = arith.constant 0.000000e+00 : f32
    %59 = vector.broadcast %cst_25 : f32 to vector<8x128xf32>
    %60 = arith.maximumf %58, %59 : vector<8x128xf32>
    %61 = arith.subf %60, %43 : vector<8x128xf32>
    %62 = arith.mulf %57, %61 : vector<8x128xf32>
    %63 = arith.addf %43, %62 : vector<8x128xf32>
    %c0_26 = arith.constant 0 : index
    %c0_27 = arith.constant 0 : index
    %64 = vector.load %arg4[%c0_26, %c0_27] : memref<8x128xf32, #tpu.memory_space<vmem>>, vector<8x128xf32>
    tpu.vector_store %arg4[%c0_26, %c0_27], %63 {strides = array<i32>} : memref<8x128xf32, #tpu.memory_space<vmem>>, vector<8x128xf32>,
    return
  }
  func.func @transform_0(%arg0: i32) -> (i32, i32) {
    %c0_i32 = arith.constant 0 : i32
    %c0_i32_0 = arith.constant 0 : i32
    %c0_i32_1 = arith.constant 0 : i32
    return %c0_i32, %c0_i32_0 : i32, i32
  }
  func.func @transform_1(%arg0: i32) -> (i32, i32, i32) {
    %c0_i32 = arith.constant 0 : i32
    %c0_i32_0 = arith.constant 0 : i32
    %c0_i32_1 = arith.constant 0 : i32
    return %arg0, %c0_i32, %c0_i32_0 : i32, i32, i32
  }
  func.func @transform_2(%arg0: i32) -> (i32, i32, i32) {
    %c0_i32 = arith.constant 0 : i32
    %c0_i32_0 = arith.constant 0 : i32
    %c0_i32_1 = arith.constant 0 : i32
    return %arg0, %c0_i32, %c0_i32_0 : i32, i32, i32
  }
  func.func @transform_3(%arg0: i32) -> (i32, i32) {
    %c0_i32 = arith.constant 0 : i32
    %c0_i32_0 = arith.constant 0 : i32
    %c0_i32_1 = arith.constant 0 : i32
    return %c0_i32, %c0_i32_0 : i32, i32
  }
}

</mosaic_0001>

<bundles_post_ra>
// kernel: tpu_custom_call.1
= control target key start
LH: loop header
LB: loop body
LE: loop exit
PB: predicated region body
PF: predicated region fallthrough
CT: control target
= control target key end

     0   :  { %8 = vsyncpa [#allocation3], 0  ;;  %s853_s0 = inlined_call_operand.hbm [shape: f32[8,128], index: 0, kind: input, shape index: {}, may-alias: {0,3}]   ;;  %s854_s1 = inlined_call_operand.hbm [shape: bf16[3,128,256], index: 1, kind: input, shape index: {}]   ;;  %s855_s2 = inlined_call_operand.vmem [shape: f32[3,1,256], index: 2, kind: input, shape index: {}]   ;;  %s856_s3 = inlined_call_operand.hbm [shape: f32[8,128], index: 3, kind: output, shape index: {}, may-alias: {0,3}]  }
   0x1   :  { %9 = vsyncpa [#allocation6], 0 }
   0x2   :  { %10 = vsyncpa [#allocation4], 0  ;;  %s765_s12 = smov [#allocation2]   ;;  %s766_s14 = smov [#allocation5]  }
   0x3   :  { %s17_s13 = sshll.u32 %s765_s12, 4  ;;  %s26_s15 = sshll.u32 %s766_s14, 4  ;;  %s18_s13 = int_to_ptr.vmem [resolvable:$true] %s17_s13  ;;  %s791_s15 = int_to_ptr.vmem [resolvable:$true] %s26_s15 }
   0x4   :  { %s693_s18 = scalar_lea.hbm %s853_s0, 128 }
   0x5   :  { %p694_p0 = scmp.ne.s32.totalorder %s853_s0, %s693_s18  ;;  %p697_p1 = scmp.lt.u32.totalorder %s693_s18, %s853_s0 }
   0x7   :  { %p699_p2 = pnand %p697_p1, %p694_p0 }
   0x9   :  { %702 = shalt.err (!%p699_p2)
}
   0xa   :  { %s703_s23 = scalar_lea.vmem %s18_s13, 128  ;;  %p708_p4 = scmp.lt.s32.totalorder %s18_s13, %s18_s13 }
   0xb   :  { %p704_p3 = scmp.ne.s32.totalorder %s18_s13, %s703_s23  ;;  %p709_p5 = scmp.lt.s32.totalorder %s703_s23, %s703_s23 }
   0xd   :  { %p710_p6 = por %p709_p5, %p708_p4 }
   0xf   :  { %p711_p7 = pnand %p710_p6, %p704_p3 }
  0x11   :  { %714 = shalt.err (!%p711_p7)
}
  0x12   :  { %20 = dma.hbm_to_vmem [thread:$0]  %s853_s0, 128, %s18_s13, [#allocation3]  }
  0x13   :  { %s715_s28 = scalar_lea.hbm %s854_s1, 6144 }
  0x14   :  { %p716_p8 = scmp.ne.s32.totalorder %s854_s1, %s715_s28  ;;  %p719_p9 = scmp.lt.u32.totalorder %s715_s28, %s854_s1 }
  0x16   :  { %p721_p10 = pnand %p719_p9, %p716_p8 }
  0x18   :  { %724 = shalt.err (!%p721_p10)
}
  0x19   :  { %s725_s6 = scalar_lea.vmem %s791_s15, 6144  ;;  %p730_p12 = scmp.lt.s32.totalorder %s791_s15, %s791_s15 }
  0x1a   :  { %p726_p11 = scmp.ne.s32.totalorder %s791_s15, %s725_s6  ;;  %p731_p13 = scmp.lt.s32.totalorder %s725_s6, %s725_s6 }
  0x1c   :  { %p732_p0 = por %p731_p13, %p730_p12 }
  0x1e   :  { %p733_p1 = pnand %p732_p0, %p726_p11 }
  0x20   :  { %736 = shalt.err (!%p733_p1)
}
  0x21   :  { %s767_s0 = smov 128   ;;  %s768_s7 = smov 8  }
  0x22   :  { %32 = dma.hbm_to_vmem [thread:$0]  %s854_s1, 6144, %s791_s15, [#allocation6], %s767_s0, %s767_s0, %s768_s7  }
  0x23   :  { %759 = dma.done.wait [#allocation3], 128  }
  0x24   :  { %760 = vsyncadd [#allocation3], 4294967168 }
  0x25   :  { %761 = dma.done.wait [#allocation6], 6144  }
  0x26   :  { %762 = vsyncadd [#allocation6], 4294961152  ;;  %v769_v0 = vmov 0   ;;  %v609_v1 = vld [vmem:[#allocation5 + $0x4] ss:$8 sps:$4 sm:$0xff]   ;;  %v46_v17 = vld [vmem:[#allocation2] sm:$0xff]  ;;  %v68_v35 = vlaneseq }
  0x27   :  { %190 = vmatprep.mubr.bf16.mxu0 %v769_v0  ;;  %352 = vmatprep.mubr.bf16.mxu1 %v769_v0  ;;  %v611_v2 = vld [vmem:[#allocation5] ss:$8 sps:$4 sm:$0xff]   ;;  %v612_v3 = vld [vmem:[#allocation5 + $0x14] ss:$8 sps:$4 sm:$0xff]   ;;  %v614_v4 = vld [vmem:[#allocation5 + $0x10] ss:$8 sps:$4 sm:$0xff]   ;;  %v49_v18 = vpack.c.bf16 %v46_v17, %v46_v17 }
  0x28   :  { %158 = vmatprep.subr.bf16.mxu0 %v609_v1  ;;  %v615_v5 = vld [vmem:[#allocation5 + $0x24] ss:$8 sps:$4 sm:$0xff]   ;;  %v617_v6 = vld [vmem:[#allocation5 + $0x20] ss:$8 sps:$4 sm:$0xff]   ;;  %v618_v7 = vld [vmem:[#allocation5 + $0x34] ss:$8 sps:$4 sm:$0xff]  }
  0x29   :  { %159 = vmatpush1.bf16.msra.mxu0 %v611_v2  ;;  %v620_v8 = vld [vmem:[#allocation5 + $0x30] ss:$8 sps:$4 sm:$0xff]   ;;  %v621_v9 = vld [vmem:[#allocation5 + $0x44] ss:$8 sps:$4 sm:$0xff]   ;;  %v623_v10 = vld [vmem:[#allocation5 + $0x40] ss:$8 sps:$4 sm:$0xff]  }
  0x2a   :  { %160 = vmatprep.subr.bf16.mxu0 %v612_v3  ;;  %v624_v11 = vld [vmem:[#allocation5 + $0x54] ss:$8 sps:$4 sm:$0xff]   ;;  %v626_v12 = vld [vmem:[#allocation5 + $0x50] ss:$8 sps:$4 sm:$0xff]   ;;  %v627_v13 = vld [vmem:[#allocation5 + $0x64] ss:$8 sps:$4 sm:$0xff]  }
  0x2b   :  { %v629_v14 = vld [vmem:[#allocation5 + $0x60] ss:$8 sps:$4 sm:$0xff]   ;;  %v630_v15 = vld [vmem:[#allocation5 + $0x74] ss:$8 sps:$4 sm:$0xff]   ;;  %v632_v16 = vld [vmem:[#allocation5 + $0x70] ss:$8 sps:$4 sm:$0xff]  }
  0x2c   :  { %v633_v19 = vld [vmem:[#allocation5 + $0x84] ss:$8 sps:$4 sm:$0xff]   ;;  %v635_v20 = vld [vmem:[#allocation5 + $0x80] ss:$8 sps:$4 sm:$0xff]   ;;  %v636_v21 = vld [vmem:[#allocation5 + $0x94] ss:$8 sps:$4 sm:$0xff]  }
  0x2d   :  { %161 = vmatpush1.bf16.msra.mxu0 %v614_v4  ;;  %320 = vmatprep.subr.bf16.mxu1 %v633_v19  ;;  %v638_v22 = vld [vmem:[#allocation5 + $0x90] ss:$8 sps:$4 sm:$0xff]   ;;  %v639_v23 = vld [vmem:[#allocation5 + $0xa4] ss:$8 sps:$4 sm:$0xff]   ;;  %v641_v24 = vld [vmem:[#allocation5 + $0xa0] ss:$8 sps:$4 sm:$0xff]  }
  0x2e   :  { %162 = vmatprep.subr.bf16.mxu0 %v615_v5  ;;  %321 = vmatpush1.bf16.msra.mxu1 %v635_v20  ;;  %v642_v25 = vld [vmem:[#allocation5 + $0xb4] ss:$8 sps:$4 sm:$0xff]   ;;  %v644_v26 = vld [vmem:[#allocation5 + $0xb0] ss:$8 sps:$4 sm:$0xff]   ;;  %v645_v27 = vld [vmem:[#allocation5 + $0xc4] ss:$8 sps:$4 sm:$0xff]  }
  0x2f   :  { %322 = vmatprep.subr.bf16.mxu1 %v636_v21  ;;  %v647_v28 = vld [vmem:[#allocation5 + $0xc0] ss:$8 sps:$4 sm:$0xff]   ;;  %v648_v29 = vld [vmem:[#allocation5 + $0xd4] ss:$8 sps:$4 sm:$0xff]   ;;  %v650_v30 = vld [vmem:[#allocation5 + $0xd0] ss:$8 sps:$4 sm:$0xff]  }
  0x30   :  { %v651_v31 = vld [vmem:[#allocation5 + $0xe4] ss:$8 sps:$4 sm:$0xff]   ;;  %v653_v32 = vld [vmem:[#allocation5 + $0xe0] ss:$8 sps:$4 sm:$0xff]   ;;  %v654_v33 = vld [vmem:[#allocation5 + $0xf4] ss:$8 sps:$4 sm:$0xff]  }
  0x31   :  { %163 = vmatpush1.bf16.msra.mxu0 %v617_v6  ;;  %v656_v34 = vld [vmem:[#allocation5 + $0xf0] ss:$8 sps:$4 sm:$0xff]   ;;  %v69_v36 = vshrl.u32 %v68_v35, 7  ;;  %v659_v57 = vld [vmem:[#allocation5 + $0x104] ss:$8 sps:$4 sm:$0xff]   ;;  %s770_s15 = smov [#allocation7]  }
  0x32   :  { %164 = vmatprep.subr.bf16.mxu0 %v618_v7  ;;  %323 = vmatpush1.bf16.msra.mxu1 %v638_v22  ;;  %v66_v38 = vld [vmem:[%s855_s2] sm:$0x3]  ;;  %v657_v58 = vld [vmem:[#allocation5 + $0x100] ss:$8 sps:$4 sm:$0xff]   ;;  %v662_v59 = vld [vmem:[#allocation5 + $0x114] ss:$8 sps:$4 sm:$0xff]  }
  0x33   :  { %324 = vmatprep.subr.bf16.mxu1 %v639_v23  ;;  %v822_v37 = vsub.s32 0, %v69_v36  ;;  %v828_v46 = vsub.s32 1, %v69_v36  ;;  %v660_v60 = vld [vmem:[#allocation5 + $0x110] ss:$8 sps:$4 sm:$0xff]   ;;  %v665_v61 = vld [vmem:[#allocation5 + $0x124] ss:$8 sps:$4 sm:$0xff]  }
  0x34   :  { %v663_v62 = vld [vmem:[#allocation5 + $0x120] ss:$8 sps:$4 sm:$0xff]   ;;  %v668_v63 = vld [vmem:[#allocation5 + $0x134] ss:$8 sps:$4 sm:$0xff]   ;;  %v671_v1 = vld [vmem:[#allocation5 + $0x144] ss:$8 sps:$4 sm:$0xff]  }
  0x35   :  { %165 = vmatpush1.bf16.msra.mxu0 %v620_v8  ;;  %v71_v39 = vrot.slane %v66_v38, %v822_v37  ;;  %v75_v48 = vrot.slane %v66_v38, %v828_v46  ;;  %v669_v2 = vld [vmem:[#allocation5 + $0x140] ss:$8 sps:$4 sm:$0xff]   ;;  %v674_v3 = vld [vmem:[#allocation5 + $0x154] ss:$8 sps:$4 sm:$0xff]   ;;  %v672_v4 = vld [vmem:[#allocation5 + $0x150] ss:$8 sps:$4 sm:$0xff]  }
  0x36   :  { %166 = vmatprep.subr.bf16.mxu0 %v621_v9  ;;  %325 = vmatpush1.bf16.msra.mxu1 %v641_v24  ;;  %v677_v5 = vld [vmem:[#allocation5 + $0x164] ss:$8 sps:$4 sm:$0xff]   ;;  %v675_v6 = vld [vmem:[#allocation5 + $0x160] ss:$8 sps:$4 sm:$0xff]   ;;  %v680_v7 = vld [vmem:[#allocation5 + $0x174] ss:$8 sps:$4 sm:$0xff]  }
  0x37   :  { %326 = vmatprep.subr.bf16.mxu1 %v642_v25  ;;  %v678_v8 = vld [vmem:[#allocation5 + $0x170] ss:$8 sps:$4 sm:$0xff]  }
  0x38   :  { %v567_v9 = vld [vmem:[%s855_s2 + $0x2] sm:$0x3] }
  0x39   :  { %167 = vmatpush1.bf16.msra.mxu0 %v623_v10  ;;  %v233_v10 = vrot.slane %v567_v9, %v822_v37 }
  0x3a   :  { %168 = vmatprep.subr.bf16.mxu0 %v624_v11  ;;  %327 = vmatpush1.bf16.msra.mxu1 %v644_v26 }
  0x3b   :  { %328 = vmatprep.subr.bf16.mxu1 %v645_v27  ;;  %v585_v27 = vld [vmem:[%s855_s2 + $0x4] sm:$0x3]  ;;  %s540_s2 = sshll.u32 %s770_s15, 4  ;;  %s541_s2 = int_to_ptr.vmem [resolvable:$true] %s540_s2 }
  0x3c   :  { %v399_v36 = vrot.slane %v585_v27, %v828_v46  ;;  %s737_s16 = scalar_lea.vmem %s541_s2, 128  ;;  %p742_p3 = scmp.lt.s32.totalorder %s541_s2, %s541_s2 }
  0x3d   :  { %169 = vmatpush1.bf16.msra.mxu0 %v626_v12  ;;  %p738_p2 = scmp.ne.s32.totalorder %s541_s2, %s737_s16  ;;  %p743_p4 = scmp.lt.s32.totalorder %s737_s16, %s737_s16 }
  0x3e   :  { %170 = vmatprep.subr.bf16.mxu0 %v627_v13  ;;  %329 = vmatpush1.bf16.msra.mxu1 %v647_v28  ;;  %v395_v28 = vrot.slane %v585_v27, %v822_v37 }
  0x3f   :  { %330 = vmatprep.subr.bf16.mxu1 %v648_v29  ;;  %p744_p5 = por %p743_p4, %p742_p3 }
  0x41   :  { %171 = vmatpush1.bf16.msra.mxu0 %v629_v14  ;;  %p745_p6 = pnand %p744_p5, %p738_p2 }
  0x42   :  { %172 = vmatprep.subr.bf16.mxu0 %v630_v15  ;;  %331 = vmatpush1.bf16.msra.mxu1 %v650_v30 }
  0x43   :  { %332 = vmatprep.subr.bf16.mxu1 %v651_v31 }
  0x45   :  { %173 = vmatpush1.bf16.msra.mxu0 %v632_v16 }
  0x46   :  { %333 = vmatpush1.bf16.msra.mxu1 %v653_v32  ;;  %482 = vmatprep.subr.bf16.mxu0 %v659_v57 }
  0x47   :  { %334 = vmatprep.subr.bf16.mxu1 %v654_v33 }
  0x48   :  { %191 = vmatmul.mubr.bf16.vlgmr.msra.gmra.mrb[0].mxu0 %v49_v18  ;;  %v237_v18 = vrot.slane %v567_v9, %v828_v46 }
  0x49   :  { %514 = vmatprep.mubr.bf16.mxu0 %v769_v0  ;;  %483 = vmatpush1.bf16.msra.mxu0 %v657_v58  ;;  %v666_v0 = vld [vmem:[#allocation5 + $0x130] ss:$8 sps:$4 sm:$0xff]  }
  0x4a   :  { %335 = vmatpush1.bf16.msra.mxu1 %v656_v34  ;;  %484 = vmatprep.subr.bf16.mxu0 %v662_v59 }
  0x4d   :  { %485 = vmatpush1.bf16.msra.mxu0 %v660_v60 }
  0x4e   :  { %486 = vmatprep.subr.bf16.mxu0 %v665_v61 }
  0x51   :  { %487 = vmatpush1.bf16.msra.mxu0 %v663_v62 }
  0x52   :  { %488 = vmatprep.subr.bf16.mxu0 %v668_v63 }
  0x55   :  { %489 = vmatpush1.bf16.msra.mxu0 %v666_v0 }
  0x56   :  { %490 = vmatprep.subr.bf16.mxu0 %v671_v1 }
  0x59   :  { %491 = vmatpush1.bf16.msra.mxu0 %v669_v2 }
  0x5a   :  { %492 = vmatprep.subr.bf16.mxu0 %v674_v3 }
  0x5d   :  { %493 = vmatpush1.bf16.msra.mxu0 %v672_v4 }
  0x5e   :  { %494 = vmatprep.subr.bf16.mxu0 %v677_v5 }
  0x61   :  { %495 = vmatpush1.bf16.msra.mxu0 %v675_v6 }
  0x62   :  { %496 = vmatprep.subr.bf16.mxu0 %v680_v7 }
  0x65   :  { %497 = vmatpush1.bf16.msra.mxu0 %v678_v8 }
 0x11b   :  { %v192_v40 = vpop.f32.mrb[0].mxu0 }
 0x11c   :  { %v193_v41 = vadd.f32 %v192_v40, %v71_v39  ;;  %v194_v42 = vpop.f32.mrb[1].mxu0 }
 0x11d   :  { %v196_v43 = vpop.f32.mrb[2].mxu0  ;;  %v195_v50 = vadd.f32 %v194_v42, %v75_v48 }
 0x11e   :  { %v566_v44 = vmul.f32 -1.442695, %v193_v41  ;;  %v197_v45 = vpop.f32.mrb[3].mxu0 }
 0x11f   :  { %v205_v51 = vmax.f32 %v195_v50, 0.0 }
 0x120   :  { %681 = vpow2.f32 %v566_v44 }
 0x121   :  { %v206_v52 = vsub.f32 %v205_v51, %v46_v17 }
 0x12a   :  { %v682_v47 = vpop.eup %681 }
 0x12b   :  { %v202_v49 = vadd.f32 1.0, %v682_v47 }
 0x12d   :  { %683 = vrcp.f32 %v202_v49 }
 0x137   :  { %v684_v53 = vpop.eup %683 }
 0x138   :  { %v207_v54 = vmul.f32 %v684_v53, %v206_v52 }
 0x13a   :  { %v208_v55 = vadd.f32 %v207_v54, %v46_v17 }
 0x13c   :  { %v209_v56 = vpack.c.bf16 %v208_v55, %v208_v55 }
 0x13e   :  { %353 = vmatmul.mubr.bf16.vlgmr.msra.gmra.mrb[0].mxu1 %v209_v56 }
 0x211   :  { %v354_v11 = vpop.f32.mrb[0].mxu1 }
 0x212   :  { %v355_v12 = vadd.f32 %v354_v11, %v233_v10  ;;  %v356_v13 = vpop.f32.mrb[1].mxu1 }
 0x213   :  { %v358_v14 = vpop.f32.mrb[2].mxu1  ;;  %v357_v20 = vadd.f32 %v356_v13, %v237_v18 }
 0x214   :  { %v584_v15 = vmul.f32 -1.442695, %v355_v12  ;;  %v359_v16 = vpop.f32.mrb[3].mxu1 }
 0x215   :  { %v367_v21 = vmax.f32 %v357_v20, 0.0 }
 0x216   :  { %685 = vpow2.f32 %v584_v15 }
 0x217   :  { %v368_v22 = vsub.f32 %v367_v21, %v208_v55 }
 0x220   :  { %v686_v17 = vpop.eup %685 }
 0x221   :  { %v364_v19 = vadd.f32 1.0, %v686_v17 }
 0x223   :  { %687 = vrcp.f32 %v364_v19 }
 0x22d   :  { %v688_v23 = vpop.eup %687 }
 0x22e   :  { %v369_v24 = vmul.f32 %v688_v23, %v368_v22 }
 0x230   :  { %v370_v25 = vadd.f32 %v369_v24, %v208_v55 }
 0x232   :  { %v371_v26 = vpack.c.bf16 %v370_v25, %v370_v25 }
 0x234   :  { %515 = vmatmul.mubr.bf16.vlgmr.msra.gmra.mrb[4].mxu0 %v371_v26 }
 0x307   :  { %v516_v29 = vpop.f32.mrb[4].mxu0 }
 0x308   :  { %v517_v30 = vadd.f32 %v516_v29, %v395_v28  ;;  %v518_v31 = vpop.f32.mrb[5].mxu0 }
 0x309   :  { %v520_v32 = vpop.f32.mrb[6].mxu0  ;;  %v519_v39 = vadd.f32 %v518_v31, %v399_v36 }
 0x30a   :  { %v602_v33 = vmul.f32 -1.442695, %v517_v30  ;;  %v521_v34 = vpop.f32.mrb[7].mxu0 }
 0x30b   :  { %v529_v40 = vmax.f32 %v519_v39, 0.0 }
 0x30c   :  { %689 = vpow2.f32 %v602_v33 }
 0x30d   :  { %v530_v41 = vsub.f32 %v529_v40, %v370_v25 }
 0x316   :  { %v690_v35 = vpop.eup %689 }
 0x317   :  { %v526_v38 = vadd.f32 1.0, %v690_v35 }
 0x319   :  { %691 = vrcp.f32 %v526_v38 }
 0x323   :  { %v692_v42 = vpop.eup %691 }
 0x324   :  { %v531_v43 = vmul.f32 %v692_v42, %v530_v41 }
 0x326   :  { %v532_v37 = vadd.f32 %v531_v43, %v370_v25 }
 0x328   :  { %533 = vst [vmem:[#allocation7] sm:$0xff] %v532_v37 }
 0x329   :  { %748 = shalt.err (!%p745_p6)
}
 0x32a   :  { %s749_s19 = scalar_lea.hbm %s856_s3, 128 }
 0x32b   :  { %p750_p7 = scmp.ne.s32.totalorder %s856_s3, %s749_s19  ;;  %p753_p8 = scmp.lt.u32.totalorder %s749_s19, %s856_s3 }
 0x32d   :  { %p755_p9 = pnand %p753_p8, %p750_p7 }
 0x32f   :  { %758 = shalt.err (!%p755_p9)
}
 0x330   :  { %543 = dma.vmem_to_hbm [thread:$0]  %s541_s2, 128, %s856_s3, [#allocation4]  }
 0x331   :  { %763 = dma.done.wait [#allocation4], 128  }
 0x332   :  { %764 = vsyncadd [#allocation4], 4294967168 }
 0x333   :  { %547 = vsyncpa [#allocation3], 1 }
 0x334   :  { %548 = vsyncpa [#allocation6], 1 }
 0x335   :  { %549 = vsyncpa [#allocation4], 1 }

</bundles_post_ra>
